<compile_context>
chip_gen: v6e
topology: v6e:2x2x1
jax: 0.10.0
libtpu: 0.0.40
codegen_flags: <defaults>
</compile_context>

<pallas_src>
import math
from functools import partial

import jax
import jax.numpy as jnp
from jax import lax
from jax.experimental import pallas as pl
from jax.experimental.pallas import tpu as pltpu

VOCAB = 50     # vocabulary size of the pretrained embedding table
EMBED = 32     # embedding width E
HIDDEN = 128   # LSTM hidden size H (each gate = one full 128-lane tile)
FF = 128       # feed-forward hidden width (lane aligned, == OUTP here)
B = 2          # logical batch
T = 8          # sequence length
TB = 8         # per-grid-step batch tile (f32 sublane granularity)
OUTP = 128     # padded output lanes (logit lives in column 0)


def _sigmoid_1eup(x):
    """sigmoid(x) == 0.5*(1+tanh(x/2)): one EUP push instead of exp+recip."""
    return 0.5 * (1.0 + jnp.tanh(0.5 * x))


def _sigma_kernel(len_ref,       # SMEM [Bp] int32 (scalar prefetch)
                  gi_ref,        # VMEM [T, TB, 4H] bf16  (emb@w_ih + b_lstm)
                  lens_ref,      # VMEM [TB, 1] int32
                  w_hh_ref,      # VMEM [H, 4H] bf16
                  w_ff_ref,      # VMEM [H, F] bf16
                  b_all_ref,     # VMEM [2, OUTP] f32 (row0 = b_ff, row1 = b_out)
                  w_out_ref,     # VMEM [F, OUTP] bf16 (only column 0 is real)
                  out_ref):      # VMEM [TB, OUTP] f32, lane-dense; col 0 real
    Tn = gi_ref.shape[0]
    TBn = gi_ref.shape[1]
    H = gi_ref.shape[2] // 4

    i = pl.program_id(0)

    # Per-tile max length from SMEM (scalar unit, off the serial chain); the
    # recurrence runs only num_steps iterations instead of Tn.
    t_max = jnp.int32(0)
    for b in range(TBn):                      # static scalar loop, 8 maxes
        t_max = jnp.maximum(t_max, len_ref[i * TBn + b])
    num_steps = jnp.minimum(t_max, jnp.int32(Tn))

    w_hh = w_hh_ref[...]                      # loaded once, hoisted

    # Hoisted lane-broadcast of per-row lengths: per-step masking is then a
    # single compare + two selects on the VPU (no per-step broadcast).
    lens_b = jnp.broadcast_to(lens_ref[...], (TBn, H))      # int32 [TB, H]

    def step(t, carry):
        h, c = carry                          # h: bf16 [TB,H], c: f32 [TB,H]
        # Only recurrent matmul is left on the serial chain (bf16 in, f32 acc).
        rec = jnp.dot(h, w_hh, preferred_element_type=jnp.float32)   # [TB,4H]
        gates = gi_ref[t].astype(jnp.float32) + rec
        # H == 128 -> each gate slice is a whole 128-lane tile.
        # PyTorch LSTM gate order: input, forget, cell(g), output.
        ig = _sigmoid_1eup(gates[:, 0 * H:1 * H])
        fg = _sigmoid_1eup(gates[:, 1 * H:2 * H])
        gg = jnp.tanh(gates[:, 2 * H:3 * H])
        og = _sigmoid_1eup(gates[:, 3 * H:4 * H])
        c_new = fg * c + ig * gg
        h_new = (og * jnp.tanh(c_new)).astype(jnp.bfloat16)
        # Freeze state past x_len (== reading h at position x_len - 1).
        keep = t < lens_b
        h = jnp.where(keep, h_new, h)
        c = jnp.where(keep, c_new, c)
        return h, c

    h0 = jnp.zeros((TBn, H), jnp.bfloat16)
    c0 = jnp.zeros((TBn, H), jnp.float32)
    h, _ = lax.fori_loop(0, num_steps, step, (h0, c0))

    # Feed-forward head: ReLU hidden layer, then linear to the padded logit.
    b_ff = b_all_ref[0:1, :]
    b_out = b_all_ref[1:2, :]
    z = jnp.maximum(
        jnp.dot(h, w_ff_ref[...], preferred_element_type=jnp.float32) + b_ff,
        0.0)
    logit = (jnp.dot(z.astype(jnp.bfloat16), w_out_ref[...],
                     preferred_element_type=jnp.float32) + b_out)
    out_ref[...] = _sigmoid_1eup(logit)       # lane-dense [TB, 128] store


def sigma_learner_forward(params, x_tokens, x_len=None):
    """SigmaLearner.forward: sigmoid(BaseClassifier(x, x_len)). Returns [B,1] f32."""
    Bn, Tn = x_tokens.shape
    H = params["w_hh"].shape[0]
    F = params["w_ff"].shape[1]
    Bp = -(-Bn // TB) * TB                               # pad batch to sublane tile

    if x_len is None:
        x_len = jnp.full((Bn,), Tn, dtype=jnp.int32)

    # Tokens kept time-major so the gather directly yields [T, Bp, 4H]
    # (no separate [Bp, T, 4H] transpose HLO in the wrapper).
    x_t = jnp.zeros((Tn, Bp), jnp.int32).at[:, :Bn].set(
        x_tokens.astype(jnp.int32).T)
    len_pad = jnp.zeros((Bp,), jnp.int32).at[:Bn].set(x_len.astype(jnp.int32))

    # Fold the LSTM input projection into the embedding:
    # gate_table[v] = embedding[v] @ w_ih  -> input projection becomes a free
    # gather; b_lstm (= torch b_ih + b_hh) is baked in once.  Stored bf16.
    gate_table = jnp.dot(params["embedding"], params["w_ih"],
                         preferred_element_type=jnp.float32)          # [V, 4H]
    gates_in = (jnp.take(gate_table, x_t, axis=0)
                + params["b_lstm"]).astype(jnp.bfloat16)              # [T, Bp, 4H]

    lens2d = len_pad[:, None]                                         # [Bp, 1] int32

    # Merge the two tiny head biases into one [2, 128] input.
    b_all = jnp.zeros((2, OUTP), jnp.float32)
    b_all = b_all.at[0, :F].set(params["b_ff"][0])
    b_all = b_all.at[1, :1].set(params["b_out"][0])

    # Lane-dense output: pad the final projection to 128 columns (col 0 real).
    w_out = jnp.zeros((F, OUTP), jnp.float32).at[:, :1].set(params["w_out"])

    out = pl.pallas_call(
        _sigma_kernel,
        out_shape=jax.ShapeDtypeStruct((Bp, OUTP), jnp.float32),
        grid_spec=pltpu.PrefetchScalarGridSpec(
            num_scalar_prefetch=1,
            grid=(Bp // TB,),
            in_specs=[
                pl.BlockSpec((Tn, TB, 4 * H), lambda i, lens: (0, i, 0)),  # gates_in
                pl.BlockSpec((TB, 1), lambda i, lens: (i, 0)),             # lens2d
                pl.BlockSpec((H, 4 * H), lambda i, lens: (0, 0)),          # w_hh
                pl.BlockSpec((H, F), lambda i, lens: (0, 0)),              # w_ff
                pl.BlockSpec((2, OUTP), lambda i, lens: (0, 0)),           # b_all
                pl.BlockSpec((F, OUTP), lambda i, lens: (0, 0)),           # w_out
            ],
            out_specs=pl.BlockSpec((TB, OUTP), lambda i, lens: (i, 0)),
        ),
        compiler_params=pltpu.CompilerParams(
            dimension_semantics=("parallel",)),   # megacore when grid >= 2 (v7x)
    )(len_pad, gates_in, lens2d,
      params["w_hh"].astype(jnp.bfloat16),
      params["w_ff"].astype(jnp.bfloat16),
      b_all,
      w_out.astype(jnp.bfloat16))

    return out[:Bn, :1]                                  # [B, 1] probabilities


def _reference_forward(params, x_tokens, x_len):
    """Pure-JAX f32 reference of the same forward semantics."""
    H = params["w_hh"].shape[0]
    emb = params["embedding"][x_tokens]                              # [B, T, E]
    gi = jnp.einsum("bte,eg->btg", emb, params["w_ih"]) + params["b_lstm"]
    Bn, Tn = x_tokens.shape
    h = jnp.zeros((Bn, H), jnp.float32)
    c = jnp.zeros((Bn, H), jnp.float32)
    for t in range(Tn):
        gates = gi[:, t, :] + h @ params["w_hh"]
        ig = jax.nn.sigmoid(gates[:, 0 * H:1 * H])
        fg = jax.nn.sigmoid(gates[:, 1 * H:2 * H])
        gg = jnp.tanh(gates[:, 2 * H:3 * H])
        og = jax.nn.sigmoid(gates[:, 3 * H:4 * H])
        c_new = fg * c + ig * gg
        h_new = og * jnp.tanh(c_new)
        keep = (t < x_len)[:, None]
        h = jnp.where(keep, h_new, h)
        c = jnp.where(keep, c_new, c)
    z = jnp.maximum(h @ params["w_ff"] + params["b_ff"], 0.0)
    return jax.nn.sigmoid(z @ params["w_out"] + params["b_out"])


def init_params(key, vocab=VOCAB, embed=EMBED, hidden=HIDDEN, ff=FF):
    """Deterministic synthetic parameters (shapes implied by the module)."""
    ks = jax.random.split(key, 6)

    def unif(k, shape, fan_in):
        bound = 1.0 / math.sqrt(fan_in)
        return jax.random.uniform(k, shape, jnp.float32, -bound, bound)

    return {
        # `embedding_weights` passed to SigmaLearner.__init__ (pretrained table)
        "embedding": jax.random.normal(ks[0], (vocab, embed), jnp.float32) * 0.1,
        "w_ih": unif(ks[1], (embed, 4 * hidden), hidden),
        "w_hh": unif(ks[2], (hidden, 4 * hidden), hidden),
        "b_lstm": unif(ks[3], (1, 4 * hidden), hidden),   # == torch b_ih + b_hh
        "w_ff": unif(ks[4], (hidden, ff), hidden),
        "b_ff": jnp.zeros((1, ff), jnp.float32),
        "w_out": unif(ks[5], (ff, 1), ff),
        "b_out": jnp.zeros((1, 1), jnp.float32),
    }


if __name__ == "__main__":
    key = jax.random.PRNGKey(0)
    pkey, xkey = jax.random.split(key, 2)
    params = init_params(pkey)

    x = jax.random.randint(xkey, (B, T), 0, VOCAB, dtype=jnp.int32)   # token ids
    x_len = jnp.array([T, T - 3], dtype=jnp.int32)                    # ragged lengths

    fwd = jax.jit(partial(sigma_learner_forward, params))
    y = jax.block_until_ready(fwd(x, x_len))

    assert y.shape == (B, 1) and y.dtype == jnp.float32
    assert bool(jnp.all(jnp.isfinite(y)))
    assert bool(jnp.all((y >= 0.0) & (y <= 1.0)))   # sigmoid output range

    # Loose tolerance: kernel runs bf16 matmul operands / h carry (f32 elsewhere).
    y_ref = _reference_forward(params, x, x_len)
    assert bool(jnp.allclose(y, y_ref, atol=5e-2)), (y, y_ref)

    print("KERNEL_OK")
</pallas_src>

<mosaic_0001>
module attributes {stable_mosaic.version = 11 : i64} {
  func.func @_sigma_kernel(%arg0: i32, %arg1: memref<8xi32, #tpu.memory_space<smem>>, %arg2: memref<8x8x512xbf16, #tpu.memory_space<vmem>>, %arg3: memref<8x1xi32, #tpu.memory_space<vmem>>, %arg4: memref<128x512xbf16, #tpu.memory_space<vmem>>, %arg5: memref<128x128xbf16, #tpu.memory_space<vmem>>, %arg6: memref<2x128xf32, #tpu.memory_space<vmem>>, %arg7: memref<128x128xbf16, #tpu.memory_space<vmem>>, %arg8: memref<8x128xf32, #tpu.memory_space<vmem>>) attributes {dimension_semantics = [#tpu.dimension_semantics<parallel>], iteration_bounds = array<i64: 1>, scalar_prefetch = 1 : i64, scratch_operands = 0 : i64, tpu.core_type = #tpu.core_type<tc>, window_params = [{transform_indices = @transform_0, window_bounds = array<i64: 8, 8, 512>}, {transform_indices = @transform_1, window_bounds = array<i64: 8, 1>}, {pipeline_mode = #tpu.pipeline_mode<synchronous>, transform_indices = @transform_2, window_bounds = array<i64: 128, 512>}, {pipeline_mode = #tpu.pipeline_mode<synchronous>, transform_indices = @transform_3, window_bounds = array<i64: 128, 128>}, {pipeline_mode = #tpu.pipeline_mode<synchronous>, transform_indices = @transform_4, window_bounds = array<i64: 2, 128>}, {pipeline_mode = #tpu.pipeline_mode<synchronous>, transform_indices = @transform_5, window_bounds = array<i64: 128, 128>}, {transform_indices = @transform_6, window_bounds = array<i64: 8, 128>}]} {
    %c8_i32 = arith.constant 8 : i32
    %0 = arith.muli %arg0, %c8_i32 : i32
    %c0_i32 = arith.constant 0 : i32
    %1 = arith.addi %0, %c0_i32 : i32
    %2 = arith.index_cast %1 : i32 to index
    %3 = memref.load %arg1[%2] : memref<8xi32, #tpu.memory_space<smem>>
    %c0_i32_0 = arith.constant 0 : i32
    %4 = arith.maxsi %c0_i32_0, %3 : i32
    %c8_i32_1 = arith.constant 8 : i32
    %5 = arith.muli %arg0, %c8_i32_1 : i32
    %c1_i32 = arith.constant 1 : i32
    %6 = arith.addi %5, %c1_i32 : i32
    %7 = arith.index_cast %6 : i32 to index
    %8 = memref.load %arg1[%7] : memref<8xi32, #tpu.memory_space<smem>>
    %9 = arith.maxsi %4, %8 : i32
    %c8_i32_2 = arith.constant 8 : i32
    %10 = arith.muli %arg0, %c8_i32_2 : i32
    %c2_i32 = arith.constant 2 : i32
    %11 = arith.addi %10, %c2_i32 : i32
    %12 = arith.index_cast %11 : i32 to index
    %13 = memref.load %arg1[%12] : memref<8xi32, #tpu.memory_space<smem>>
    %14 = arith.maxsi %9, %13 : i32
    %c8_i32_3 = arith.constant 8 : i32
    %15 = arith.muli %arg0, %c8_i32_3 : i32
    %c3_i32 = arith.constant 3 : i32
    %16 = arith.addi %15, %c3_i32 : i32
    %17 = arith.index_cast %16 : i32 to index
    %18 = memref.load %arg1[%17] : memref<8xi32, #tpu.memory_space<smem>>
    %19 = arith.maxsi %14, %18 : i32
    %c8_i32_4 = arith.constant 8 : i32
    %20 = arith.muli %arg0, %c8_i32_4 : i32
    %c4_i32 = arith.constant 4 : i32
    %21 = arith.addi %20, %c4_i32 : i32
    %22 = arith.index_cast %21 : i32 to index
    %23 = memref.load %arg1[%22] : memref<8xi32, #tpu.memory_space<smem>>
    %24 = arith.maxsi %19, %23 : i32
    %c8_i32_5 = arith.constant 8 : i32
    %25 = arith.muli %arg0, %c8_i32_5 : i32
    %c5_i32 = arith.constant 5 : i32
    %26 = arith.addi %25, %c5_i32 : i32
    %27 = arith.index_cast %26 : i32 to index
    %28 = memref.load %arg1[%27] : memref<8xi32, #tpu.memory_space<smem>>
    %29 = arith.maxsi %24, %28 : i32
    %c8_i32_6 = arith.constant 8 : i32
    %30 = arith.muli %arg0, %c8_i32_6 : i32
    %c6_i32 = arith.constant 6 : i32
    %31 = arith.addi %30, %c6_i32 : i32
    %32 = arith.index_cast %31 : i32 to index
    %33 = memref.load %arg1[%32] : memref<8xi32, #tpu.memory_space<smem>>
    %34 = arith.maxsi %29, %33 : i32
    %c8_i32_7 = arith.constant 8 : i32
    %35 = arith.muli %arg0, %c8_i32_7 : i32
    %c7_i32 = arith.constant 7 : i32
    %36 = arith.addi %35, %c7_i32 : i32
    %37 = arith.index_cast %36 : i32 to index
    %38 = memref.load %arg1[%37] : memref<8xi32, #tpu.memory_space<smem>>
    %39 = arith.maxsi %34, %38 : i32
    %c8_i32_8 = arith.constant 8 : i32
    %40 = arith.minsi %39, %c8_i32_8 : i32
    %c0 = arith.constant 0 : index
    %c0_9 = arith.constant 0 : index
    %41 = vector.load %arg4[%c0, %c0_9] : memref<128x512xbf16, #tpu.memory_space<vmem>>, vector<128x512xbf16>
    %c0_10 = arith.constant 0 : index
    %c0_11 = arith.constant 0 : index
    %42 = vector.load %arg3[%c0_10, %c0_11] : memref<8x1xi32, #tpu.memory_space<vmem>>, vector<8x1xi32>
    %43 = vector.shape_cast %42 : vector<8x1xi32> to vector<8x1xi32>
    %44 = vector.broadcast %43 : vector<8x1xi32> to vector<8x128xi32>
    %cst = arith.constant 0.000000e+00 : bf16
    %45 = vector.broadcast %cst : bf16 to vector<8x128xbf16>
    %cst_12 = arith.constant 0.000000e+00 : f32
    %46 = vector.broadcast %cst_12 : f32 to vector<8x128xf32>
    %c0_i32_13 = arith.constant 0 : i32
    %47 = arith.subi %40, %c0_i32_13 : i32
    %48 = arith.addi %c0_i32_13, %47 : i32
    %c1_i32_14 = arith.constant 1 : i32
    %49:2 = scf.for %arg9 = %c0_i32_13 to %48 step %c1_i32_14 iter_args(%arg10 = %45, %arg11 = %46) -> (vector<8x128xbf16>, vector<8x128xf32>)  : i32 {
      %cst_30 = arith.constant dense<0.000000e+00> : vector<8x512xf32>
      %71 = tpu.matmul %arg10, %41, %cst_30 {dimension_numbers = #tpu.dot_dimension_numbers<[1], [0], [0], [1], [0, 0, 1, 1], [], []>} : vector<8x128xbf16>, vector<128x512xbf16>, vector<8x512xf32> -> vector<8x512xf32>
      %72 = arith.index_cast %arg9 : i32 to index
      %c0_31 = arith.constant 0 : index
      %c0_32 = arith.constant 0 : index
      %73 = vector.load %arg2[%72, %c0_31, %c0_32] : memref<8x8x512xbf16, #tpu.memory_space<vmem>>, vector<1x8x512xbf16>
      %74 = vector.shape_cast %73 : vector<1x8x512xbf16> to vector<8x512xbf16>
      %75 = arith.extf %74 : vector<8x512xbf16> to vector<8x512xf32>
      %76 = arith.addf %75, %71 : vector<8x512xf32>
      %77 = vector.extract_strided_slice %76 {offsets = [0, 0], sizes = [8, 128], strides = [1, 1]} : vector<8x512xf32> to vector<8x128xf32>
      %cst_33 = arith.constant 5.000000e-01 : f32
      %78 = vector.broadcast %cst_33 : f32 to vector<8x128xf32>
      %79 = arith.mulf %78, %77 : vector<8x128xf32>
      %80 = math.tanh %79 : vector<8x128xf32>
      %cst_34 = arith.constant 1.000000e+00 : f32
      %81 = vector.broadcast %cst_34 : f32 to vector<8x128xf32>
      %82 = arith.addf %81, %80 : vector<8x128xf32>
      %cst_35 = arith.constant 5.000000e-01 : f32
      %83 = vector.broadcast %cst_35 : f32 to vector<8x128xf32>
      %84 = arith.mulf %83, %82 : vector<8x128xf32>
      %85 = vector.extract_strided_slice %76 {offsets = [0, 128], sizes = [8, 128], strides = [1, 1]} : vector<8x512xf32> to vector<8x128xf32>
      %cst_36 = arith.constant 5.000000e-01 : f32
      %86 = vector.broadcast %cst_36 : f32 to vector<8x128xf32>
      %87 = arith.mulf %86, %85 : vector<8x128xf32>
      %88 = math.tanh %87 : vector<8x128xf32>
      %cst_37 = arith.constant 1.000000e+00 : f32
      %89 = vector.broadcast %cst_37 : f32 to vector<8x128xf32>
      %90 = arith.addf %89, %88 : vector<8x128xf32>
      %cst_38 = arith.constant 5.000000e-01 : f32
      %91 = vector.broadcast %cst_38 : f32 to vector<8x128xf32>
      %92 = arith.mulf %91, %90 : vector<8x128xf32>
      %93 = vector.extract_strided_slice %76 {offsets = [0, 256], sizes = [8, 128], strides = [1, 1]} : vector<8x512xf32> to vector<8x128xf32>
      %94 = math.tanh %93 : vector<8x128xf32>
      %95 = vector.extract_strided_slice %76 {offsets = [0, 384], sizes = [8, 128], strides = [1, 1]} : vector<8x512xf32> to vector<8x128xf32>
      %cst_39 = arith.constant 5.000000e-01 : f32
      %96 = vector.broadcast %cst_39 : f32 to vector<8x128xf32>
      %97 = arith.mulf %96, %95 : vector<8x128xf32>
      %98 = math.tanh %97 : vector<8x128xf32>
      %cst_40 = arith.constant 1.000000e+00 : f32
      %99 = vector.broadcast %cst_40 : f32 to vector<8x128xf32>
      %100 = arith.addf %99, %98 : vector<8x128xf32>
      %cst_41 = arith.constant 5.000000e-01 : f32
      %101 = vector.broadcast %cst_41 : f32 to vector<8x128xf32>
      %102 = arith.mulf %101, %100 : vector<8x128xf32>
      %103 = arith.mulf %92, %arg11 : vector<8x128xf32>
      %104 = arith.mulf %84, %94 : vector<8x128xf32>
      %105 = arith.addf %103, %104 : vector<8x128xf32>
      %106 = math.tanh %105 : vector<8x128xf32>
      %107 = arith.mulf %102, %106 : vector<8x128xf32>
      %108 = arith.truncf %107 : vector<8x128xf32> to vector<8x128xbf16>
      %109 = vector.broadcast %arg9 : i32 to vector<8x128xi32>
      %110 = arith.cmpi slt, %109, %44 : vector<8x128xi32>
      %111 = arith.select %110, %108, %arg10 : vector<8x128xi1>, vector<8x128xbf16>
      %112 = arith.select %110, %105, %arg11 : vector<8x128xi1>, vector<8x128xf32>
      scf.yield %111, %112 : vector<8x128xbf16>, vector<8x128xf32>
    }
    %c0_15 = arith.constant 0 : index
    %c0_16 = arith.constant 0 : index
    %50 = vector.load %arg6[%c0_15, %c0_16] : memref<2x128xf32, #tpu.memory_space<vmem>>, vector<1x128xf32>
    %c1 = arith.constant 1 : index
    %c0_17 = arith.constant 0 : index
    %51 = vector.load %arg6[%c1, %c0_17] : memref<2x128xf32, #tpu.memory_space<vmem>>, vector<1x128xf32>
    %c0_18 = arith.constant 0 : index
    %c0_19 = arith.constant 0 : index
    %52 = vector.load %arg5[%c0_18, %c0_19] : memref<128x128xbf16, #tpu.memory_space<vmem>>, vector<128x128xbf16>
    %cst_20 = arith.constant dense<0.000000e+00> : vector<8x128xf32>
    %53 = tpu.matmul %49#0, %52, %cst_20 {dimension_numbers = #tpu.dot_dimension_numbers<[1], [0], [0], [1], [0, 0, 1, 1], [], []>} : vector<8x128xbf16>, vector<128x128xbf16>, vector<8x128xf32> -> vector<8x128xf32>
    %54 = vector.broadcast %50 : vector<1x128xf32> to vector<8x128xf32>
    %55 = arith.addf %53, %54 : vector<8x128xf32>
    %cst_21 = arith.constant 0.000000e+00 : f32
    %56 = vector.broadcast %cst_21 : f32 to vector<8x128xf32>
    %57 = arith.maximumf %55, %56 : vector<8x128xf32>
    %58 = arith.truncf %57 : vector<8x128xf32> to vector<8x128xbf16>
    %c0_22 = arith.constant 0 : index
    %c0_23 = arith.constant 0 : index
    %59 = vector.load %arg7[%c0_22, %c0_23] : memref<128x128xbf16, #tpu.memory_space<vmem>>, vector<128x128xbf16>
    %cst_24 = arith.constant dense<0.000000e+00> : vector<8x128xf32>
    %60 = tpu.matmul %58, %59, %cst_24 {dimension_numbers = #tpu.dot_dimension_numbers<[1], [0], [0], [1], [0, 0, 1, 1], [], []>} : vector<8x128xbf16>, vector<128x128xbf16>, vector<8x128xf32> -> vector<8x128xf32>
    %61 = vector.broadcast %51 : vector<1x128xf32> to vector<8x128xf32>
    %62 = arith.addf %60, %61 : vector<8x128xf32>
    %cst_25 = arith.constant 5.000000e-01 : f32
    %63 = vector.broadcast %cst_25 : f32 to vector<8x128xf32>
    %64 = arith.mulf %63, %62 : vector<8x128xf32>
    %65 = math.tanh %64 : vector<8x128xf32>
    %cst_26 = arith.constant 1.000000e+00 : f32
    %66 = vector.broadcast %cst_26 : f32 to vector<8x128xf32>
    %67 = arith.addf %66, %65 : vector<8x128xf32>
    %cst_27 = arith.constant 5.000000e-01 : f32
    %68 = vector.broadcast %cst_27 : f32 to vector<8x128xf32>
    %69 = arith.mulf %68, %67 : vector<8x128xf32>
    %c0_28 = arith.constant 0 : index
    %c0_29 = arith.constant 0 : index
    %70 = vector.load %arg8[%c0_28, %c0_29] : memref<8x128xf32, #tpu.memory_space<vmem>>, vector<8x128xf32>
    tpu.vector_store %arg8[%c0_28, %c0_29], %69 {strides = array<i32>} : memref<8x128xf32, #tpu.memory_space<vmem>>, vector<8x128xf32>,
    return
  }
  func.func @transform_0(%arg0: i32, %arg1: memref<8xi32, #tpu.memory_space<smem>>) -> (i32, i32, i32) {
    %c0_i32 = arith.constant 0 : i32
    %c0_i32_0 = arith.constant 0 : i32
    %c0_i32_1 = arith.constant 0 : i32
    return %c0_i32, %arg0, %c0_i32_0 : i32, i32, i32
  }
  func.func @transform_1(%arg0: i32, %arg1: memref<8xi32, #tpu.memory_space<smem>>) -> (i32, i32) {
    %c0_i32 = arith.constant 0 : i32
    %c0_i32_0 = arith.constant 0 : i32
    return %arg0, %c0_i32 : i32, i32
  }
  func.func @transform_2(%arg0: i32, %arg1: memref<8xi32, #tpu.memory_space<smem>>) -> (i32, i32) {
    %c0_i32 = arith.constant 0 : i32
    %c0_i32_0 = arith.constant 0 : i32
    %c0_i32_1 = arith.constant 0 : i32
    return %c0_i32, %c0_i32_0 : i32, i32
  }
  func.func @transform_3(%arg0: i32, %arg1: memref<8xi32, #tpu.memory_space<smem>>) -> (i32, i32) {
    %c0_i32 = arith.constant 0 : i32
    %c0_i32_0 = arith.constant 0 : i32
    %c0_i32_1 = arith.constant 0 : i32
    return %c0_i32, %c0_i32_0 : i32, i32
  }
  func.func @transform_4(%arg0: i32, %arg1: memref<8xi32, #tpu.memory_space<smem>>) -> (i32, i32) {
    %c0_i32 = arith.constant 0 : i32
    %c0_i32_0 = arith.constant 0 : i32
    %c0_i32_1 = arith.constant 0 : i32
    return %c0_i32, %c0_i32_0 : i32, i32
  }
  func.func @transform_5(%arg0: i32, %arg1: memref<8xi32, #tpu.memory_space<smem>>) -> (i32, i32) {
    %c0_i32 = arith.constant 0 : i32
    %c0_i32_0 = arith.constant 0 : i32
    %c0_i32_1 = arith.constant 0 : i32
    return %c0_i32, %c0_i32_0 : i32, i32
  }
  func.func @transform_6(%arg0: i32, %arg1: memref<8xi32, #tpu.memory_space<smem>>) -> (i32, i32) {
    %c0_i32 = arith.constant 0 : i32
    %c0_i32_0 = arith.constant 0 : i32
    return %arg0, %c0_i32 : i32, i32
  }
}

</mosaic_0001>

<bundles_post_ra>
// kernel: sigma_learner_forward.1
= control target key start
LH: loop header
LB: loop body
LE: loop exit
PB: predicated region body
PF: predicated region fallthrough
CT: control target
= control target key end

     0   :  { %s1247_s0 = inlined_call_operand.vmem [shape: s32[8], index: 0, kind: input, shape index: {}]   ;;  %s1248_s1 = inlined_call_operand.vmem [shape: bf16[8,8,512], index: 1, kind: input, shape index: {}]   ;;  %s1249_s2 = inlined_call_operand.vmem [shape: s32[8,1], index: 2, kind: input, shape index: {}]   ;;  %s1250_s3 = inlined_call_operand.vmem [shape: bf16[128,512], index: 3, kind: input, shape index: {}]   ;;  %s1251_s4 = inlined_call_operand.vmem [shape: bf16[128,128], index: 4, kind: input, shape index: {}]   ;;  %s1252_s5 = inlined_call_operand.vmem [shape: f32[2,128], index: 5, kind: input, shape index: {}]   ;;  %s1253_s6 = inlined_call_operand.vmem [shape: bf16[128,128], index: 6, kind: input, shape index: {}]   ;;  %s1254_s7 = inlined_call_operand.vmem [shape: f32[8,128], index: 7, kind: output, shape index: {}]  }
   0x1   :  { %s12_s26 = sshll.u32 %s1247_s0, 4  ;;  %s13_s26 = int_to_ptr.vmem [resolvable:$true] %s12_s26 }
   0x2   :  { %s818_s27 = scalar_lea.vmem %s13_s26, 16  ;;  %p823_p1 = scmp.lt.s32.totalorder %s13_s26, %s13_s26 }
   0x3   :  { %p819_p0 = scmp.ne.s32.totalorder %s13_s26, %s818_s27  ;;  %p824_p2 = scmp.lt.s32.totalorder %s818_s27, %s818_s27 }
   0x5   :  { %p825_p3 = por %p824_p2, %p823_p1 }
   0x7   :  { %p826_p4 = pnand %p825_p3, %p819_p0 }
   0x9   :  { %829 = shalt.err (!%p826_p4)  }
   0xa   :  { %s864_s28 = smov [#allocation3]  }
   0xb   :  { %15 = dma.vmem_to_smem %s13_s26, 16, %s864_s28, [#allocation2] }
   0xc   :  { %846 = dma.done.wait [#allocation2], 16 }
   0xd   :  { %847 = vsyncadd [#allocation2], 4294967280 }
   0xe   :  { %17 = sfence }
   0xf   :  { %v97_v0 = vld [vmem:[%s1249_s2] sm:$0xff]  ;;  %s915_s8 = sld [smem:[#allocation3]]  ;;  %v925_v2 = vld [vmem:[%s1250_s3 + $0x8] sm:$0xff]  ;;  %v865_v3 = vmov 0   ;;  %v930_v4 = vld [vmem:[%s1250_s3 + $0x10] sm:$0xff]  ;;  %v1087_v35 = vmov 0  }
  0x10   :  { %v920_v1 = vld [vmem:[%s1250_s3] sm:$0xff]  ;;  %789 = vset.pattern.permute.xlu0 %v865_v3  ;;  %v935_v5 = vld [vmem:[%s1250_s3 + $0x18] sm:$0xff]  ;;  %s942_s17 = sld [smem:[#allocation3 + $0x1]]  ;;  %v947_v7 = vld [vmem:[%s1250_s3 + $0x28] sm:$0xff] }
  0x11   :  { %v940_v6 = vld [vmem:[%s1250_s3 + $0x20] sm:$0xff]  ;;  %99 = vperm.xlu0 %789, %v97_v0   ;;  %v952_v8 = vld [vmem:[%s1250_s3 + $0x30] sm:$0xff]  ;;  %v957_v9 = vld [vmem:[%s1250_s3 + $0x38] sm:$0xff]  ;;  %s631_s19 = sld [smem:[#allocation3 + $0x2]] }
  0x12   :  { %v962_v10 = vld [vmem:[%s1250_s3 + $0x40] sm:$0xff]  ;;  %v967_v11 = vld [vmem:[%s1250_s3 + $0x48] sm:$0xff]  ;;  %v972_v12 = vld [vmem:[%s1250_s3 + $0x50] sm:$0xff]  ;;  %s632_s22 = sld [smem:[#allocation3 + $0x3]] }
  0x13   :  { %v977_v13 = vld [vmem:[%s1250_s3 + $0x58] sm:$0xff]  ;;  %v982_v14 = vld [vmem:[%s1250_s3 + $0x60] sm:$0xff]  ;;  %v987_v15 = vld [vmem:[%s1250_s3 + $0x68] sm:$0xff]  ;;  %s633_s29 = sld [smem:[#allocation3 + $0x4]] }
  0x14   :  { %v992_v16 = vld [vmem:[%s1250_s3 + $0x70] sm:$0xff]  ;;  %v997_v17 = vld [vmem:[%s1250_s3 + $0x78] sm:$0xff]  ;;  %v1002_v18 = vld [vmem:[%s1250_s3 + $0x80] sm:$0xff]  ;;  %s634_s30 = sld [smem:[#allocation3 + $0x5]] }
  0x15   :  { %p33_p5 = scmp.gt.s32.totalorder %s915_s8, 0  ;;  %v1008_v19 = vld [vmem:[%s1250_s3 + $0x88] sm:$0xff]  ;;  %v1013_v20 = vld [vmem:[%s1250_s3 + $0x90] sm:$0xff]  ;;  %v1018_v21 = vld [vmem:[%s1250_s3 + $0x98] sm:$0xff]  ;;  %s635_s0 = sld [smem:[#allocation3 + $0x6]] }
  0x16   :  { %v1023_v22 = vld [vmem:[%s1250_s3 + $0xa0] sm:$0xff]  ;;  %v1028_v23 = vld [vmem:[%s1250_s3 + $0xa8] sm:$0xff]  ;;  %v1033_v24 = vld [vmem:[%s1250_s3 + $0xb0] sm:$0xff]  ;;  %s636_s9 = sld [smem:[#allocation3 + $0x7]] }
  0x17   :  { %s1258_s8 = smov (!%p33_p5, %s915_s8), 0  ;;  %v1039_v25 = vld [vmem:[%s1250_s3 + $0xb8] sm:$0xff]  ;;  %v1044_v26 = vld [vmem:[%s1250_s3 + $0xc0] sm:$0xff]  ;;  %v1049_v27 = vld [vmem:[%s1250_s3 + $0xc8] sm:$0xff] }
  0x18   :  { %v1054_v28 = vld [vmem:[%s1250_s3 + $0xd0] sm:$0xff]  ;;  %v1059_v29 = vld [vmem:[%s1250_s3 + $0xd8] sm:$0xff]  ;;  %v1064_v30 = vld [vmem:[%s1250_s3 + $0xe0] sm:$0xff]  ;;  %p37_p6 = scmp.gt.s32.totalorder %s1258_s8, %s942_s17 }
  0x19   :  { %v1070_v31 = vld [vmem:[%s1250_s3 + $0xe8] sm:$0xff]  ;;  %v1075_v32 = vld [vmem:[%s1250_s3 + $0xf0] sm:$0xff]  ;;  %v1080_v33 = vld [vmem:[%s1250_s3 + $0xf8] sm:$0xff] }
  0x1a   :  { %s1260_s8 = smov (!%p37_p6, %s1258_s8), %s942_s17 }
  0x1b   :  { %p41_p7 = scmp.gt.s32.totalorder %s1260_s8, %s631_s19 }
  0x1d   :  { %s1262_s8 = smov (!%p41_p7, %s1260_s8), %s631_s19 }
  0x1e   :  { %p45_p8 = scmp.gt.s32.totalorder %s1262_s8, %s632_s22 }
  0x20   :  { %s1264_s8 = smov (!%p45_p8, %s1262_s8), %s632_s22 }
  0x21   :  { %p49_p9 = scmp.gt.s32.totalorder %s1264_s8, %s633_s29 }
  0x23   :  { %s1266_s8 = smov (!%p49_p9, %s1264_s8), %s633_s29 }
  0x24   :  { %p53_p10 = scmp.gt.s32.totalorder %s1266_s8, %s634_s30 }
  0x26   :  { %s1268_s8 = smov (!%p53_p10, %s1266_s8), %s634_s30 }
  0x27   :  { %p57_p11 = scmp.gt.s32.totalorder %s1268_s8, %s635_s0 }
  0x29   :  { %s1270_s8 = smov (!%p57_p11, %s1268_s8), %s635_s0 }
  0x2a   :  { %p61_p12 = scmp.gt.s32.totalorder %s1270_s8, %s636_s9 }
  0x2c   :  { %s1272_s8 = smov (!%p61_p12, %s1270_s8), %s636_s9 }
  0x2d   :  { %p63_p13 = scmp.lt.s32.totalorder %s1272_s8, 8  ;;  %p690_p0 = scmp.le.s32.totalorder %s1272_s8, 0 }
  0x2e   :  { %s1093_s17 = smov (!%p690_p0), 0  }
  0x2f   :  { %s1083_s3 = scalar_select %p63_p13, %s1272_s8, 8 }
  0x88   :  { %623 = sbr.rel (%p690_p0) target bundleno = 417 (0x1a1), region = 46 }
  0x8c   :  { %v1085_v34 = vpop.permute.xlu0 %99 }
  0x8d   :  { %v1089_v36 = vmov 0.0   ;;  %v1091_v37 = vmov 0  }
  0x8e LB: > { %v667_v38 = vcombine.high %v1064_v30, %v1075_v32  ;;  %v666_v39 = vcombine.low %v1064_v30, %v1075_v32  ;;  %v669_v40 = vcombine.high %v1070_v31, %v1080_v33  ;;  %v668_v41 = vcombine.low %v1070_v31, %v1080_v33  ;;  %s693_s8 = sshll.u32 %s858_s17, 4  ;;  %s858_s17 = sphi %s1093_s17, %s104_s17   ;;  %v854_v37 = vphi %v1091_v37, %v1255_v37   ;;  %v850_v36 = vphi %v1089_v36, %v387_v36  }
  0x8f   : > { %v663_v42 = vcombine.high %v1044_v26, %v1054_v28  ;;  %v665_v43 = vcombine.high %v1049_v27, %v1059_v29  ;;  %v662_v44 = vcombine.low %v1044_v26, %v1054_v28  ;;  %v664_v45 = vcombine.low %v1049_v27, %v1059_v29  ;;  %s353_s11 = scalar_lea.vmem %s1248_s1, %s693_s8 }
  0x90   : > { %269 = vmatprep.subr.bf16.mxu0 %v667_v38  ;;  %310 = vmatprep.subr.bf16.mxu1 %v669_v40  ;;  %v659_v46 = vcombine.high %v1023_v22, %v1033_v24  ;;  %v661_v47 = vcombine.high %v1028_v23, %v1039_v25  ;;  %v866_v48 = vmov 0   ;;  %v658_v49 = vcombine.low %v1023_v22, %v1033_v24 }
  0x91   : > { %270 = vmatpush1.bf16.msra.mxu0 %v666_v39  ;;  %311 = vmatpush1.bf16.msra.mxu1 %v668_v41  ;;  %v660_v50 = vcombine.low %v1028_v23, %v1039_v25  ;;  %v655_v51 = vcombine.high %v1002_v18, %v1013_v20  ;;  %v657_v52 = vcombine.high %v1008_v19, %v1018_v21 }
  0x92   : > { %271 = vmatprep.subr.bf16.mxu0 %v663_v42  ;;  %312 = vmatprep.subr.bf16.mxu1 %v665_v43  ;;  %v654_v53 = vcombine.low %v1002_v18, %v1013_v20  ;;  %v656_v54 = vcombine.low %v1008_v19, %v1018_v21  ;;  %v651_v55 = vcombine.high %v982_v14, %v992_v16  ;;  %v354_v42 = vld [vmem:[%s353_s11] sm:$0xff] }
  0x93   : > { %301 = vmatprep.mubr.bf16.mxu0 %v866_v48  ;;  %342 = vmatprep.mubr.bf16.mxu1 %v866_v48  ;;  %v653_v56 = vcombine.high %v987_v15, %v997_v17  ;;  %v650_v57 = vcombine.low %v982_v14, %v992_v16  ;;  %v652_v58 = vcombine.low %v987_v15, %v997_v17  ;;  %v356_v43 = vunpack.c.l.bf16 %v354_v42 }
  0x94   : > { %v647_v59 = vcombine.high %v962_v10, %v972_v12  ;;  %v649_v60 = vcombine.high %v967_v11, %v977_v13  ;;  %v646_v61 = vcombine.low %v962_v10, %v972_v12  ;;  %v648_v62 = vcombine.low %v967_v11, %v977_v13 }
  0x95   : > { %272 = vmatpush1.bf16.msra.mxu0 %v662_v44  ;;  %313 = vmatpush1.bf16.msra.mxu1 %v664_v45  ;;  %v643_v63 = vcombine.high %v940_v6, %v952_v8  ;;  %v645_v0 = vcombine.high %v947_v7, %v957_v9  ;;  %v642_v3 = vcombine.low %v940_v6, %v952_v8  ;;  %v355_v44 = vld [vmem:[%s353_s11 + $0x8] sm:$0xff]  ;;  %v357_v45 = vunpack.c.h.bf16 %v354_v42 }
  0x96   : > { %273 = vmatprep.subr.bf16.mxu0 %v659_v46  ;;  %314 = vmatprep.subr.bf16.mxu1 %v661_v47  ;;  %v644_v35 = vcombine.low %v947_v7, %v957_v9  ;;  %v639_v38 = vcombine.high %v920_v1, %v930_v4  ;;  %v641_v39 = vcombine.high %v925_v2, %v935_v5 }
  0x97   : > { %v638_v40 = vcombine.low %v920_v1, %v930_v4  ;;  %v640_v41 = vcombine.low %v925_v2, %v935_v5 }
  0x99   : > { %274 = vmatpush1.bf16.msra.mxu0 %v658_v49  ;;  %315 = vmatpush1.bf16.msra.mxu1 %v660_v50  ;;  %v358_v49 = vunpack.c.l.bf16 %v355_v44 }
  0x9a   : > { %275 = vmatprep.subr.bf16.mxu0 %v655_v51  ;;  %316 = vmatprep.subr.bf16.mxu1 %v657_v52 }
  0x9d   : > { %276 = vmatpush1.bf16.msra.mxu0 %v654_v53  ;;  %317 = vmatpush1.bf16.msra.mxu1 %v656_v54 }
  0x9e   : > { %277 = vmatprep.subr.bf16.mxu0 %v651_v55  ;;  %318 = vmatprep.subr.bf16.mxu1 %v653_v56 }
  0xa1   : > { %278 = vmatpush1.bf16.msra.mxu0 %v650_v57  ;;  %319 = vmatpush1.bf16.msra.mxu1 %v652_v58 }
  0xa2   : > { %279 = vmatprep.subr.bf16.mxu0 %v647_v59  ;;  %320 = vmatprep.subr.bf16.mxu1 %v649_v60  ;;  %v359_v60 = vunpack.c.h.bf16 %v355_v44 }
  0xa5   : > { %280 = vmatpush1.bf16.msra.mxu0 %v646_v61  ;;  %321 = vmatpush1.bf16.msra.mxu1 %v648_v62 }
  0xa6   : > { %281 = vmatprep.subr.bf16.mxu0 %v643_v63  ;;  %322 = vmatprep.subr.bf16.mxu1 %v645_v0 }
  0xa9   : > { %282 = vmatpush1.bf16.msra.mxu0 %v642_v3  ;;  %323 = vmatpush1.bf16.msra.mxu1 %v644_v35 }
  0xaa   : > { %283 = vmatprep.subr.bf16.mxu0 %v639_v38  ;;  %324 = vmatprep.subr.bf16.mxu1 %v641_v39 }
  0xad   : > { %284 = vmatpush1.bf16.msra.mxu0 %v638_v40  ;;  %325 = vmatpush1.bf16.msra.mxu1 %v640_v41  ;;  %v383_v40 = vstv %s858_s17  ;;  %s104_s17 = sadd.s32 1, %s858_s17  }
  0xae   : > { %vm384_vm0 = vcmp.lt.s32.totalorder %v383_v40, %v1085_v34  ;;  %p103_p1 = scmp.ge.s32.totalorder %s104_s17, %s1083_s3 }
  0xaf   : > { %vm385_vm1 = vmpackc.low %vm384_vm0, %vm384_vm0 }
  0xb0   : > { %302 = vmatmul.mubr.bf16.vlgmr.msra.gmra.mxu0 %v854_v37  ;;  %343 = vmatmul.mubr.bf16.vlgmr.msra.gmra.mxu1 %v854_v37 }
 0x170   : > { %v303_v46 = vpop.f32.mrf.mxu0  ;;  %v344_v47 = vpop.f32.mrf.mxu1 }
 0x171   : > { %v360_v48 = vadd.f32 %v356_v43, %v303_v46  ;;  %v362_v57 = vadd.f32 %v358_v49, %v344_v47 }
 0x172   : > { %v305_v50 = vpop.f32.mrf.mxu0  ;;  %v346_v51 = vpop.f32.mrf.mxu1 }
 0x173   : > { %v364_v52 = vmul.f32 0.5, %v360_v48  ;;  %v361_v53 = vadd.f32 %v357_v45, %v305_v50  ;;  %v363_v61 = vadd.f32 %v359_v60, %v346_v51 }
 0x174   : > { %v307_v54 = vpop.f32.mrf.mxu0  ;;  %v348_v55 = vpop.f32.mrf.mxu1 }
 0x175   : > { %790 = vtanh.f32 %v364_v52  ;;  %v368_v56 = vmul.f32 0.5, %v361_v53  ;;  %v373_v62 = vmul.f32 0.5, %v363_v61 }
 0x176   : > { %v308_v58 = vpop.f32.mrf.mxu0  ;;  %v349_v59 = vpop.f32.mrf.mxu1 }
 0x177   : > { %792 = vtanh.f32 %v368_v56 }
 0x178   : > { %794 = vtanh.f32 %v362_v57 }
 0x179   : > { %796 = vtanh.f32 %v373_v62 }
 0x182   : > { %v791_v63 = vpop.eup %790 }
 0x183   : > { %v366_v0 = vadd.f32 1.0, %v791_v63 }
 0x184   : > { %v793_v3 = vpop.eup %792 }
 0x185   : > { %v367_v35 = vmul.f32 0.5, %v366_v0  ;;  %v370_v38 = vadd.f32 1.0, %v793_v3  ;;  %v795_v39 = vpop.eup %794 }
 0x186   : > { %v797_v44 = vpop.eup %796 }
 0x187   : > { %v371_v41 = vmul.f32 0.5, %v370_v38  ;;  %v378_v43 = vmul.f32 %v795_v39, %v367_v35  ;;  %v375_v46 = vadd.f32 1.0, %v797_v44 }
 0x189   : > { %v377_v42 = vmul.f32 %v850_v36, %v371_v41  ;;  %v376_v47 = vmul.f32 0.5, %v375_v46 }
 0x18b   : > { %v379_v45 = vadd.f32 %v378_v43, %v377_v42 }
 0x18d   : > { %798 = vtanh.f32 %v379_v45  ;;  %v387_v36 = vsel %vm384_vm0, %v379_v45, %v850_v36  }
 0x19a   : > { %v799_v48 = vpop.eup %798 }
 0x19b   : > { %v381_v49 = vmul.f32 %v799_v48, %v376_v47 }
 0x19c   :  { %106 = sbr.rel (!%p103_p1) target bundleno = 142 (0x8e), region = 52 }
 0x19d   : > { %v382_v50 = vpack.c.bf16 %v381_v49, %v381_v49 }
 0x19f   : > { %v386_v51 = vsel %vm385_vm1, %v382_v50, %v854_v37  }
 0x1a0   : > { %v1255_v37 = vmov %v386_v51  ;;  %v1256_v35 = vmov (%p103_p1), %v386_v51 }
 0x1a1 PF:  { %v800_v37 = vld [vmem:[%s1251_s4 + $0x38] sm:$0xff]   ;;  %v867_v52 = vmov 0.0   ;;  %v801_v53 = vld [vmem:[%s1251_s4 + $0x30] sm:$0xff]   ;;  %vm868_vm2 = vmmov 0   ;;  %v802_v1 = vld [vmem:[%s1251_s4 + $0x28] sm:$0xff]   ;;  %v862_v35 = vphi %v1087_v35, %v1256_v35  }
 0x1a2   :  { %712 = vmatprep.subr.bf16.mxu0 %v867_v52  ;;  %732 = vmatprep.subr.bf16.mxu1 %v867_v52  ;;  %v808_v2 = vld [vmem:[%s1253_s6 + $0x38] sm:$0xff]   ;;  %v803_v4 = vld [vmem:[%s1251_s4 + $0x20] sm:$0xff]   ;;  %v809_v5 = vld [vmem:[%s1253_s6 + $0x30] sm:$0xff]  }
 0x1a3   :  { %713 = vmatpush3.bf16.msra.mxu0 %v800_v37  ;;  %728 = vmatprep.mubr.msk.bf16.mxu0 %vm868_vm2, %v867_v52  ;;  %v804_v6 = vld [vmem:[%s1251_s4 + $0x18] sm:$0xff]   ;;  %v810_v7 = vld [vmem:[%s1253_s6 + $0x28] sm:$0xff]   ;;  %v805_v8 = vld [vmem:[%s1251_s4 + $0x10] sm:$0xff]  }
 0x1a4   :  { %714 = vmatprep.subr.bf16.mxu0 %v867_v52  ;;  %748 = vmatprep.mubr.msk.bf16.mxu1 %vm868_vm2, %v867_v52  ;;  %v811_v9 = vld [vmem:[%s1253_s6 + $0x20] sm:$0xff]   ;;  %v806_v10 = vld [vmem:[%s1251_s4 + $0x8] sm:$0xff]   ;;  %v812_v11 = vld [vmem:[%s1253_s6 + $0x18] sm:$0xff]  }
 0x1a5   :  { %733 = vmatpush3.bf16.msra.mxu1 %v808_v2  ;;  %v807_v12 = vld [vmem:[%s1251_s4] sm:$0xff]   ;;  %v813_v13 = vld [vmem:[%s1253_s6 + $0x10] sm:$0xff]   ;;  %v814_v14 = vld [vmem:[%s1253_s6 + $0x8] sm:$0xff]  }
 0x1a6   :  { %734 = vmatprep.subr.bf16.mxu1 %v867_v52  ;;  %v815_v15 = vld [vmem:[%s1253_s6] sm:$0xff]  }
 0x1a7   :  { %715 = vmatpush3.bf16.msra.mxu0 %v801_v53  ;;  %v672_v16 = vld [vmem:[%s1252_s5] ss:$0 sm:$0xff]  ;;  %v681_v24 = vld [vmem:[%s1252_s5 + $0x1] ss:$0 sm:$0xff] }
 0x1a8   :  { %716 = vmatprep.subr.bf16.mxu0 %v867_v52 }
 0x1a9   :  { %735 = vmatpush3.bf16.msra.mxu1 %v809_v5 }
 0x1aa   :  { %736 = vmatprep.subr.bf16.mxu1 %v867_v52 }
 0x1ab   :  { %717 = vmatpush3.bf16.msra.mxu0 %v802_v1 }
 0x1ac   :  { %718 = vmatprep.subr.bf16.mxu0 %v867_v52 }
 0x1ad   :  { %737 = vmatpush3.bf16.msra.mxu1 %v810_v7 }
 0x1ae   :  { %738 = vmatprep.subr.bf16.mxu1 %v867_v52 }
 0x1af   :  { %719 = vmatpush3.bf16.msra.mxu0 %v803_v4 }
 0x1b0   :  { %720 = vmatprep.subr.bf16.mxu0 %v867_v52 }
 0x1b1   :  { %739 = vmatpush3.bf16.msra.mxu1 %v811_v9 }
 0x1b2   :  { %740 = vmatprep.subr.bf16.mxu1 %v867_v52 }
 0x1b3   :  { %721 = vmatpush3.bf16.msra.mxu0 %v804_v6 }
 0x1b4   :  { %722 = vmatprep.subr.bf16.mxu0 %v867_v52 }
 0x1b5   :  { %741 = vmatpush3.bf16.msra.mxu1 %v812_v11 }
 0x1b6   :  { %742 = vmatprep.subr.bf16.mxu1 %v867_v52 }
 0x1b7   :  { %723 = vmatpush3.bf16.msra.mxu0 %v805_v8 }
 0x1b8   :  { %724 = vmatprep.subr.bf16.mxu0 %v867_v52 }
 0x1b9   :  { %743 = vmatpush3.bf16.msra.mxu1 %v813_v13 }
 0x1ba   :  { %744 = vmatprep.subr.bf16.mxu1 %v867_v52 }
 0x1bb   :  { %725 = vmatpush3.bf16.msra.mxu0 %v806_v10 }
 0x1bc   :  { %726 = vmatprep.subr.bf16.mxu0 %v867_v52 }
 0x1bd   :  { %745 = vmatpush3.bf16.msra.mxu1 %v814_v14 }
 0x1be   :  { %746 = vmatprep.subr.bf16.mxu1 %v867_v52 }
 0x1bf   :  { %727 = vmatpush3.bf16.msra.mxu0 %v807_v12 }
 0x1c1   :  { %747 = vmatpush3.bf16.msra.mxu1 %v815_v15 }
 0x1c2   :  { %729 = vmatmul.mubr.bf16.vlgmr.msra.gmra.mxu0 %v862_v35 }
 0x282   :  { %v492_v17 = vpop.f32.mrf.mxu0 }
 0x283   :  { %v493_v18 = vadd.f32 %v672_v16, %v492_v17 }
 0x284   :  { %v730_v19 = vpop.f32.mrf.mxu0 }
 0x285   :  { %v498_v20 = vmax.f32 %v493_v18, 0.0 }
 0x286   :  { %v495_v21 = vpop.f32.mrf.mxu0 }
 0x287   :  { %v499_v22 = vpack.c.bf16 %v498_v20, %v498_v20 }
 0x288   :  { %v731_v23 = vpop.f32.mrf.mxu0 }
 0x289   :  { %749 = vmatmul.mubr.bf16.vlgmr.msra.gmra.mxu1 %v499_v22 }
 0x349   :  { %v602_v25 = vpop.f32.mrf.mxu1 }
 0x34a   :  { %v603_v26 = vadd.f32 %v681_v24, %v602_v25 }
 0x34b   :  { %v750_v27 = vpop.f32.mrf.mxu1 }
 0x34c   :  { %v608_v28 = vmul.f32 0.5, %v603_v26 }
 0x34d   :  { %v605_v29 = vpop.f32.mrf.mxu1 }
 0x34e   :  { %816 = vtanh.f32 %v608_v28 }
 0x34f   :  { %v751_v30 = vpop.f32.mrf.mxu1 }
 0x35b   :  { %v817_v31 = vpop.eup %816 }
 0x35c   :  { %v610_v32 = vadd.f32 1.0, %v817_v31 }
 0x35e   :  { %v611_v33 = vmul.f32 0.5, %v610_v32 }
 0x360   :  { %612 = vst [vmem:[%s1254_s7] sm:$0xff] %v611_v33 }

</bundles_post_ra>
